<compile_context>
chip_gen: v7x
topology: tpu7x:2x2x1
jax: 0.10.0
libtpu: 0.0.40
codegen_flags: <defaults>
</compile_context>

<pallas_src>
from functools import partial

import jax
import jax.numpy as jnp
from jax.experimental import pallas as pl
from jax.experimental.pallas import tpu as pltpu


def _round_up(n, m):
    return ((n + m - 1) // m) * m


def _silu(g):
    # silu(g) = g * sigmoid(g) = g / (1 + exp(-g)); exp + approx reciprocal run
    # on the EUP slot (idle while the MXU works) instead of a VALU divide.
    return g * pl.reciprocal(1.0 + jnp.exp(-g), approx=True)


def _kernel_gated_split(x_ref, w1g_ref, w1u_ref, w2_ref, o_ref, acc_ref):
    """Gated path, nk > 1: gate/up W1 column tiles arrive as two VMEM blocks."""
    k = pl.program_id(1)

    @pl.when(k == 0)
    def _init():
        acc_ref[...] = jnp.zeros_like(acc_ref)

    x = x_ref[...]                                                    # (tm, H) bf16
    g = jnp.dot(x, w1g_ref[...], preferred_element_type=jnp.float32)  # (tm, ti) f32
    u = jnp.dot(x, w1u_ref[...], preferred_element_type=jnp.float32)  # (tm, ti) f32
    h = _silu(g) * u
    acc_ref[...] += jnp.dot(h.astype(w2_ref.dtype), w2_ref[...],
                            preferred_element_type=jnp.float32)

    @pl.when(k == pl.num_programs(1) - 1)
    def _finalize():
        o_ref[...] = acc_ref[...].astype(o_ref.dtype)


def _kernel_single(x_ref, w1_ref, w2_ref, o_ref, acc_ref, *, gated, ti):
    """Single-W1-block path: gated with nk == 1 (or interleaved fallback), or non-gated."""
    k = pl.program_id(1)

    @pl.when(k == 0)
    def _init():
        acc_ref[...] = jnp.zeros_like(acc_ref)

    x = x_ref[...]
    y = jnp.dot(x, w1_ref[...], preferred_element_type=jnp.float32)
    if gated:
        h = _silu(y[:, :ti]) * y[:, ti:]
    else:
        h = _silu(y)
    acc_ref[...] += jnp.dot(h.astype(w2_ref.dtype), w2_ref[...],
                            preferred_element_type=jnp.float32)

    @pl.when(k == pl.num_programs(1) - 1)
    def _finalize():
        o_ref[...] = acc_ref[...].astype(o_ref.dtype)


def _tpu_params():
    """Returns (tile_budget_bytes, vmem_limit_bytes, default_tm, n_tensorcores)."""
    gen = None
    try:
        kind = jax.devices()[0].device_kind.lower()
        for g in (7, 6, 5, 4):
            if f"v{g}" in kind:
                gen = g
                break
    except Exception:
        pass
    mib = 1024 * 1024
    if gen == 7:      # 64 MiB VMEM per TC, 2 TCs -> leave headroom
        return 40 * mib, 56 * mib, 384, 2
    if gen == 6:      # 128 MiB VMEM, needs ~tm FLOP/byte -> bigger row tiles
        return 80 * mib, 104 * mib, 512, 1
    if gen == 5:      # 128 MiB VMEM, lower roofline break-even -> modest tiles
        return 64 * mib, 96 * mib, 256, 1
    return 40 * mib, 56 * mib, 256, 1   # unknown: conservative (v7x-like budget)


def yuan_expert_mlp(x, w1, w2, *, gated=True, tm=None, ti=None,
                    compute_dtype=jnp.bfloat16):
    """YuanExpertMLP forward.

    x  : (..., H)
    w1 : (H, 2*I) if gated else (H, I)   (= PyTorch self.w1.weight.T)
    w2 : (I, H)                          (= PyTorch self.w2.weight.T)
    """
    orig_shape = x.shape
    H = orig_shape[-1]
    I = w2.shape[0]
    if gated:
        assert w1.shape == (H, 2 * I), w1.shape
    else:
        assert w1.shape == (H, I), w1.shape
    assert w2.shape == (I, H), w2.shape

    x2 = x.reshape(-1, H)
    M = x2.shape[0]
    out_dtype = x.dtype
    out_bytes = jnp.dtype(out_dtype).itemsize
    cbytes = jnp.dtype(compute_dtype).itemsize

    budget, vmem_limit, default_tm, n_cores = _tpu_params()
    if tm is None:
        tm = default_tm

    xd = x2.astype(compute_dtype)
    w1d = w1.astype(compute_dtype)
    w2d = w2.astype(compute_dtype)

    # Row tile: multiple of 16 for bf16 sublane packing (8 for 4-byte dtypes).
    row_align = 16 if cbytes == 2 else 8
    tm = max(row_align, min(_round_up(tm, row_align), _round_up(M, row_align)))

    # v7x megacore: ensure the "parallel" M axis has >= 2 blocks when possible.
    if n_cores >= 2:
        while tm > row_align and _round_up(M, tm) // tm < 2:
            tm = max(row_align, (tm // 2) // row_align * row_align)

    n_w1 = 2 if gated else 1

    def tile_cost(tm_, ti_):
        # double-buffered x + out blocks, plus the f32 accumulator scratch
        fixed = 2 * tm_ * H * cbytes + 2 * tm_ * H * out_bytes + tm_ * H * 4
        # double-buffered w1 (gate + up) and w2 tiles
        w = 2 * n_w1 * H * ti_ * cbytes + 2 * ti_ * H * cbytes
        # live f32 intermediates of the activation epilogue (~3 x (tm, ti))
        inter = 3 * tm_ * ti_ * 4
        return fixed + w + inter

    # VMEM-budget-aware ti selection (largest lane-aligned divisor of I that fits);
    # if nothing fits, shrink tm and retry.
    if ti is None:
        cands = sorted({c for c in (128, 256, 512, 1024, 2048, I)
                        if c <= I and I % c == 0}, reverse=True)
        while True:
            ti = next((c for c in cands if tile_cost(tm, c) <= budget), None)
            if ti is not None or tm <= row_align:
                break
            tm = max(row_align, (tm // 2) // row_align * row_align)
        if ti is None:
            ti = cands[-1]   # smallest candidate; may exceed the soft budget
    assert I % ti == 0, (I, ti)
    nk = I // ti

    Mp = _round_up(M, tm)
    if Mp != M:
        xd = jnp.pad(xd, ((0, Mp - M), (0, 0)))

    grid = (Mp // tm, nk)
    x_spec = pl.BlockSpec((tm, H), lambda i, k: (i, 0))      # resident across k
    w2_spec = pl.BlockSpec((ti, H), lambda i, k: (k, 0))
    out_spec = pl.BlockSpec((tm, H), lambda i, k: (i, 0))

    if gated and nk > 1 and ti % 128 == 0:
        # Gate / up column tiles fetched directly from the original (H, 2I)
        # weight via two BlockSpecs — zero relayout traffic over W1.
        kernel = _kernel_gated_split
        in_specs = [x_spec,
                    pl.BlockSpec((H, ti), lambda i, k: (0, k)),       # gate cols
                    pl.BlockSpec((H, ti), lambda i, k: (0, nk + k)),  # up cols
                    w2_spec]
        operands = (xd, w1d, w1d, w2d)
    elif gated and nk > 1:
        # Rare fallback (user-supplied ti that is not lane-aligned): interleave
        # W1 once so tile k presents [gate_k | up_k].
        wg = w1d[:, :I].reshape(H, nk, ti)
        wu = w1d[:, I:].reshape(H, nk, ti)
        w1_tiled = jnp.concatenate([wg, wu], axis=2).reshape(H, nk * 2 * ti)
        kernel = partial(_kernel_single, gated=True, ti=ti)
        in_specs = [x_spec, pl.BlockSpec((H, 2 * ti), lambda i, k: (0, k)), w2_spec]
        operands = (xd, w1_tiled, w2d)
    else:
        # nk == 1 (full W1 block, natural layout) or non-gated.
        w1_bw = (2 * ti) if gated else ti
        kernel = partial(_kernel_single, gated=gated, ti=ti)
        in_specs = [x_spec, pl.BlockSpec((H, w1_bw), lambda i, k: (0, k)), w2_spec]
        operands = (xd, w1d, w2d)

    n_row_tiles = Mp // tm
    flops = (6 if gated else 4) * Mp * H * I
    weight_bytes = (w1d.size + w2d.size) * cbytes
    bytes_accessed = (Mp * H * cbytes                  # x read (once)
                      + n_row_tiles * weight_bytes     # weights re-streamed per row tile
                      + Mp * H * out_bytes)            # output write

    out = pl.pallas_call(
        kernel,
        out_shape=jax.ShapeDtypeStruct((Mp, H), out_dtype),
        grid_spec=pltpu.PrefetchScalarGridSpec(
            num_scalar_prefetch=0,
            grid=grid,
            in_specs=in_specs,
            out_specs=out_spec,
            scratch_shapes=[pltpu.VMEM((tm, H), jnp.float32)],   # f32 accumulator
        ),
        compiler_params=pltpu.CompilerParams(
            dimension_semantics=("parallel", "arbitrary"),
            vmem_limit_bytes=vmem_limit),
        cost_estimate=pl.CostEstimate(flops=flops,
                                      transcendentals=Mp * I,
                                      bytes_accessed=bytes_accessed),
    )(*operands)

    if Mp != M:
        out = out[:M]
    return out.reshape(orig_shape[:-1] + (H,))


def yuan_expert_mlp_ref(x, w1, w2, *, gated=True, compute_dtype=jnp.bfloat16):
    """Pure-JAX reference using the same bf16-operand / f32-accumulate pipeline."""
    H = x.shape[-1]
    I = w2.shape[0]
    x2 = x.reshape(-1, H).astype(compute_dtype)
    w1d = w1.astype(compute_dtype)
    w2d = w2.astype(compute_dtype)
    y = jnp.dot(x2, w1d, preferred_element_type=jnp.float32)
    if gated:
        g, u = y[:, :I], y[:, I:]
        h = (g * jax.nn.sigmoid(g)) * u
    else:
        h = y * jax.nn.sigmoid(y)
    out = jnp.dot(h.astype(compute_dtype), w2d, preferred_element_type=jnp.float32)
    return out.astype(x.dtype).reshape(x.shape[:-1] + (H,))


if __name__ == "__main__":
    # Small shapes consistent with the module: batch=2, seq=8, hidden=32, ffn=64.
    batch, seq, hidden, ffn = 2, 8, 32, 64

    key = jax.random.PRNGKey(0)
    kx, k1, k2 = jax.random.split(key, 3)

    x = jax.random.normal(kx, (batch, seq, hidden), dtype=jnp.float32)
    # Weights stored as (in, out) = PyTorch weight.T
    w1 = jax.random.normal(k1, (hidden, 2 * ffn), dtype=jnp.float32) * 0.05  # gated: H -> 2I
    w2 = jax.random.normal(k2, (ffn, hidden), dtype=jnp.float32) * 0.05      # I -> H

    # Gated (gated_linear_unit=True) path — the standard Yuan MoE expert.
    out = jax.block_until_ready(yuan_expert_mlp(x, w1, w2, gated=True))
    ref = yuan_expert_mlp_ref(x, w1, w2, gated=True)
    assert out.shape == x.shape
    assert jnp.allclose(out, ref, atol=2e-2, rtol=2e-2), "gated mismatch vs reference"

    # Non-gated (gated_linear_unit=False) path.
    w1_ng = jax.random.normal(k1, (hidden, ffn), dtype=jnp.float32) * 0.05
    out_ng = jax.block_until_ready(yuan_expert_mlp(x, w1_ng, w2, gated=False))
    ref_ng = yuan_expert_mlp_ref(x, w1_ng, w2, gated=False)
    assert jnp.allclose(out_ng, ref_ng, atol=2e-2, rtol=2e-2), "non-gated mismatch vs reference"

    # Larger-I case exercising the dual-BlockSpec (no-relayout) gate/up path
    # with nk > 1, plus M padding (seq=5 -> M=10 padded to the row tile).
    hidden2, ffn2, seq2 = 32, 256, 5
    x_b = jax.random.normal(kx, (batch, seq2, hidden2), dtype=jnp.float32)
    w1_b = jax.random.normal(k1, (hidden2, 2 * ffn2), dtype=jnp.float32) * 0.05
    w2_b = jax.random.normal(k2, (ffn2, hidden2), dtype=jnp.float32) * 0.05
    out_b = jax.block_until_ready(yuan_expert_mlp(x_b, w1_b, w2_b, gated=True, ti=128))
    ref_b = yuan_expert_mlp_ref(x_b, w1_b, w2_b, gated=True)
    assert out_b.shape == x_b.shape
    assert jnp.allclose(out_b, ref_b, atol=2e-2, rtol=2e-2), "split-path mismatch vs reference"

    print("KERNEL_OK")
</pallas_src>

<mosaic_0001>
module attributes {stable_mosaic.version = 11 : i64} {
  func.func @_kernel_single(%arg0: i32, %arg1: i32, %arg2: memref<16x32xbf16, #tpu.memory_space<vmem>>, %arg3: memref<32x128xbf16, #tpu.memory_space<vmem>>, %arg4: memref<64x32xbf16, #tpu.memory_space<vmem>>, %arg5: memref<16x32xf32, #tpu.memory_space<vmem>>, %arg6: memref<16x32xf32, #tpu.memory_space<vmem>>) attributes {dimension_semantics = [#tpu.dimension_semantics<parallel>, #tpu.dimension_semantics<arbitrary>], iteration_bounds = array<i64: 1, 1>, scalar_prefetch = 0 : i64, scratch_operands = 1 : i64, tpu.core_type = #tpu.core_type<tc>, window_params = [{transform_indices = @transform_0, window_bounds = array<i64: 16, 32>}, {transform_indices = @transform_1, window_bounds = array<i64: 32, 128>}, {transform_indices = @transform_2, window_bounds = array<i64: 64, 32>}, {transform_indices = @transform_3, window_bounds = array<i64: 16, 32>}]} {
    %c0_i32 = arith.constant 0 : i32
    %0 = arith.cmpi eq, %arg1, %c0_i32 : i32
    %1 = arith.extui %0 : i1 to i32
    %c0_i32_0 = arith.constant 0 : i32
    %2 = arith.cmpi ne, %1, %c0_i32_0 : i32
    scf.if %2 {
      %cst_15 = arith.constant 0.000000e+00 : f32
      %25 = vector.broadcast %cst_15 : f32 to vector<16x32xf32>
      %c0_16 = arith.constant 0 : index
      %c0_17 = arith.constant 0 : index
      %26 = vector.load %arg6[%c0_16, %c0_17] : memref<16x32xf32, #tpu.memory_space<vmem>>, vector<16x32xf32>
      tpu.vector_store %arg6[%c0_16, %c0_17], %25 {strides = array<i32>} : memref<16x32xf32, #tpu.memory_space<vmem>>, vector<16x32xf32>,
    } else {
    }
    %c0 = arith.constant 0 : index
    %c0_1 = arith.constant 0 : index
    %3 = vector.load %arg2[%c0, %c0_1] : memref<16x32xbf16, #tpu.memory_space<vmem>>, vector<16x32xbf16>
    %c0_2 = arith.constant 0 : index
    %c0_3 = arith.constant 0 : index
    %4 = vector.load %arg3[%c0_2, %c0_3] : memref<32x128xbf16, #tpu.memory_space<vmem>>, vector<32x128xbf16>
    %cst = arith.constant dense<0.000000e+00> : vector<16x128xf32>
    %5 = tpu.matmul %3, %4, %cst {dimension_numbers = #tpu.dot_dimension_numbers<[1], [0], [0], [1], [0, 0, 1, 1], [], []>} : vector<16x32xbf16>, vector<32x128xbf16>, vector<16x128xf32> -> vector<16x128xf32>
    %6 = vector.extract_strided_slice %5 {offsets = [0, 0], sizes = [16, 64], strides = [1, 1]} : vector<16x128xf32> to vector<16x64xf32>
    %cst_4 = arith.constant 0.000000e+00 : f32
    %7 = vector.broadcast %cst_4 : f32 to vector<16x64xf32>
    %8 = arith.subf %7, %6 : vector<16x64xf32>
    %9 = math.exp %8 : vector<16x64xf32>
    %cst_5 = arith.constant 1.000000e+00 : f32
    %10 = vector.broadcast %cst_5 : f32 to vector<16x64xf32>
    %11 = arith.addf %10, %9 : vector<16x64xf32>
    %12 = tpu.reciprocal %11 {approx = true} : vector<16x64xf32> -> vector<16x64xf32>
    %13 = arith.mulf %6, %12 : vector<16x64xf32>
    %14 = vector.extract_strided_slice %5 {offsets = [0, 64], sizes = [16, 64], strides = [1, 1]} : vector<16x128xf32> to vector<16x64xf32>
    %15 = arith.mulf %13, %14 : vector<16x64xf32>
    %c0_6 = arith.constant 0 : index
    %c0_7 = arith.constant 0 : index
    %16 = vector.load %arg6[%c0_6, %c0_7] : memref<16x32xf32, #tpu.memory_space<vmem>>, vector<16x32xf32>
    %17 = arith.truncf %15 : vector<16x64xf32> to vector<16x64xbf16>
    %c0_8 = arith.constant 0 : index
    %c0_9 = arith.constant 0 : index
    %18 = vector.load %arg4[%c0_8, %c0_9] : memref<64x32xbf16, #tpu.memory_space<vmem>>, vector<64x32xbf16>
    %cst_10 = arith.constant dense<0.000000e+00> : vector<16x32xf32>
    %19 = tpu.matmul %17, %18, %cst_10 {dimension_numbers = #tpu.dot_dimension_numbers<[1], [0], [0], [1], [0, 0, 1, 1], [], []>} : vector<16x64xbf16>, vector<64x32xbf16>, vector<16x32xf32> -> vector<16x32xf32>
    %20 = arith.addf %16, %19 : vector<16x32xf32>
    %c0_11 = arith.constant 0 : index
    %c0_12 = arith.constant 0 : index
    %21 = vector.load %arg6[%c0_11, %c0_12] : memref<16x32xf32, #tpu.memory_space<vmem>>, vector<16x32xf32>
    tpu.vector_store %arg6[%c0_11, %c0_12], %20 {strides = array<i32>} : memref<16x32xf32, #tpu.memory_space<vmem>>, vector<16x32xf32>,
    %c0_i32_13 = arith.constant 0 : i32
    %22 = arith.cmpi eq, %arg1, %c0_i32_13 : i32
    %23 = arith.extui %22 : i1 to i32
    %c0_i32_14 = arith.constant 0 : i32
    %24 = arith.cmpi ne, %23, %c0_i32_14 : i32
    scf.if %24 {
      %c0_15 = arith.constant 0 : index
      %c0_16 = arith.constant 0 : index
      %25 = vector.load %arg6[%c0_15, %c0_16] : memref<16x32xf32, #tpu.memory_space<vmem>>, vector<16x32xf32>
      %c0_17 = arith.constant 0 : index
      %c0_18 = arith.constant 0 : index
      %26 = vector.load %arg5[%c0_17, %c0_18] : memref<16x32xf32, #tpu.memory_space<vmem>>, vector<16x32xf32>
      tpu.vector_store %arg5[%c0_17, %c0_18], %25 {strides = array<i32>} : memref<16x32xf32, #tpu.memory_space<vmem>>, vector<16x32xf32>,
    } else {
    }
    return
  }
  func.func @transform_0(%arg0: i32, %arg1: i32) -> (i32, i32) {
    %c0_i32 = arith.constant 0 : i32
    %c0_i32_0 = arith.constant 0 : i32
    return %arg0, %c0_i32 : i32, i32
  }
  func.func @transform_1(%arg0: i32, %arg1: i32) -> (i32, i32) {
    %c0_i32 = arith.constant 0 : i32
    %c0_i32_0 = arith.constant 0 : i32
    return %c0_i32, %arg1 : i32, i32
  }
  func.func @transform_2(%arg0: i32, %arg1: i32) -> (i32, i32) {
    %c0_i32 = arith.constant 0 : i32
    %c0_i32_0 = arith.constant 0 : i32
    return %arg1, %c0_i32 : i32, i32
  }
  func.func @transform_3(%arg0: i32, %arg1: i32) -> (i32, i32) {
    %c0_i32 = arith.constant 0 : i32
    %c0_i32_0 = arith.constant 0 : i32
    return %arg0, %c0_i32 : i32, i32
  }
}

</mosaic_0001>

<bundles_post_ra>
// kernel: tpu_custom_call.1
= control target key start
LH: loop header
LB: loop body
LE: loop exit
PB: predicated region body
PF: predicated region fallthrough
CT: control target
= control target key end

     0   :  { %v302_v1 = vmov 0.0   ;;  %vm303_vm0 = vmmov 0   ;;  %vm20_vm1 = vcmask 261120   ;;  %s368_s0 = inlined_call_operand.vmem [shape: bf16[16,32], index: 0, kind: input, shape index: {}]   ;;  %s369_s1 = inlined_call_operand.vmem [shape: bf16[32,128], index: 1, kind: input, shape index: {}]   ;;  %s370_s2 = inlined_call_operand.vmem [shape: bf16[64,32], index: 2, kind: input, shape index: {}]   ;;  %s371_s3 = inlined_call_operand.hbm [shape: f32[16,32], index: 3, kind: output, shape index: {}]  }
   0x1   :  { %v263_v0 = vld [vmem:[%s369_s1] sm:$0xff]   ;;  %237 = vmatprep.subr.bf16.mxu0 %v302_v1  ;;  %245 = vmatprep.subr.bf16.mxu1 %v302_v1  ;;  %v264_v2 = vld [vmem:[%s369_s1 + $0x8] sm:$0xff]   ;;  %21 = vst.msk [vmem:[#allocation2] sm:$0xff] %vm20_vm1, %v302_v1  ;;  %22 = vst.msk [vmem:[#allocation2 + $0x8] sm:$0xff] %vm20_vm1, %v302_v1 }
   0x2   :  { %238 = vmatpush3.bf16.msra.mxu0 %v263_v0  ;;  %241 = vmatprep.mubr.msk.bf16.mxu0 %vm303_vm0, %v302_v1  ;;  %v265_v3 = vld [vmem:[%s368_s0] sm:$0xff]  }
   0x3   :  { %239 = vmatprep.subr.bf16.mxu0 %v302_v1  ;;  %253 = vmatprep.mubr.msk.bf16.mxu1 %vm303_vm0, %v302_v1 }
   0x4   :  { %8 = vsyncpa [#allocation4], 0  ;;  %v266_v4 = vld [vmem:[%s370_s2] sm:$0xff]   ;;  %v267_v5 = vld [vmem:[%s370_s2 + $0x8] sm:$0xff]   ;;  %s304_s24 = smov 64   ;;  %vm148_vm2 = vcmask 523264  }
   0x5   :  { %246 = vmatpush3.bf16.msra.mxu1 %v266_v4  ;;  %v268_v6 = vld [vmem:[%s370_s2 + $0x10] sm:$0xff]   ;;  %v269_v7 = vld [vmem:[%s370_s2 + $0x18] sm:$0xff]   ;;  %s305_s2 = smov [#allocation3]  }
   0x6   :  { %240 = vmatpush3.bf16.msra.mxu0 %v264_v2  ;;  %247 = vmatprep.subr.bf16.mxu1 %v302_v1  ;;  %s209_s25 = sshll.u32 %s305_s2, 4  ;;  %s210_s25 = int_to_ptr.vmem [resolvable:$true] %s209_s25 }
   0x7   :  { %s278_s26 = scalar_lea.vmem %s210_s25, 256  ;;  %p283_p1 = scmp.lt.s32.totalorder %s210_s25, %s210_s25 }
   0x8   :  { %v113_v29 = vld [vmem:[#allocation2] sm:$0xff]  ;;  %v114_v31 = vld [vmem:[#allocation2 + $0x8] sm:$0xff]  ;;  %p279_p0 = scmp.ne.s32.totalorder %s210_s25, %s278_s26  ;;  %p284_p2 = scmp.lt.s32.totalorder %s278_s26, %s278_s26 }
   0x9   :  { %242 = vmatmul.mubr.msk.bf16.vlgmr.msra.gmra.mrb[0].mxu0 %vm20_vm1, %v265_v3  ;;  %248 = vmatpush3.bf16.msra.mxu1 %v267_v5 }
   0xa   :  { %249 = vmatprep.subr.bf16.mxu1 %v302_v1  ;;  %p285_p3 = por %p284_p2, %p283_p1 }
   0xc   :  { %p286_p4 = pnand %p285_p3, %p279_p0 }
   0xd   :  { %250 = vmatpush3.bf16.msra.mxu1 %v268_v6 }
   0xe   :  { %251 = vmatprep.subr.bf16.mxu1 %v302_v1 }
  0x11   :  { %252 = vmatpush3.bf16.msra.mxu1 %v269_v7 }
  0xdc   :  { %v84_v8 = vpop.f32.mrb[0].mxu0 }
  0xdd   :  { %105 = vrot.lane.b32.xlu0 %v84_v8, %s304_s24  ;;  %v243_v9 = vpop.f32.mrb[1].mxu0  ;;  %v91_v12 = vsub.f32 0.0, %v84_v8 }
  0xde   :  { %v87_v10 = vpop.f32.mrb[2].mxu0 }
  0xdf   :  { %v244_v11 = vpop.f32.mrb[3].mxu0  ;;  %v92_v13 = vsub.f32 0.0, %v87_v10  ;;  %v93_v14 = vmul.f32 1.442695, %v91_v12 }
  0xe1   :  { %107 = vrot.lane.b32.xlu0 %v87_v10, %s304_s24  ;;  %v95_v15 = vmul.f32 1.442695, %v92_v13  ;;  %270 = vpow2.f32 %v93_v14 }
  0xe3   :  { %272 = vpow2.f32 %v95_v15 }
  0xeb   :  { %v271_v16 = vpop.eup %270 }
  0xec   :  { %v97_v18 = vadd.f32 1.0, %v271_v16 }
  0xed   :  { %v273_v17 = vpop.eup %272 }
  0xee   :  { %v98_v19 = vadd.f32 1.0, %v273_v17  ;;  %274 = vrcp.f32 %v97_v18 }
  0xf0   :  { %276 = vrcp.f32 %v98_v19 }
  0xf8   :  { %v275_v20 = vpop.eup %274 }
  0xf9   :  { %v101_v23 = vmul.f32 %v275_v20, %v84_v8 }
  0xfa   :  { %v277_v21 = vpop.eup %276 }
  0xfb   :  { %v102_v24 = vmul.f32 %v277_v21, %v87_v10 }
 0x14f   :  { %v106_v22 = vpop.permute.xlu0 %105 }
 0x150   :  { %v111_v26 = vmul.f32 %v106_v22, %v101_v23 }
 0x153   :  { %v108_v25 = vpop.permute.xlu0 %107 }
 0x154   :  { %v112_v27 = vmul.f32 %v108_v25, %v102_v24 }
 0x156   :  { %v115_v28 = vpack.c.bf16 %v112_v27, %v111_v26 }
 0x158   :  { %254 = vmatmul.mubr.msk.bf16.vlgmr.msra.gmra.mrb[0].mxu1 %vm148_vm2, %v115_v28 }
 0x22b   :  { %v186_v30 = vpop.f32.mrb[0].mxu1 }
 0x22c   :  { %v193_v32 = vadd.f32 %v186_v30, %v113_v29  ;;  %v255_v33 = vpop.f32.mrb[1].mxu1 }
 0x22d   :  { %v189_v34 = vpop.f32.mrb[2].mxu1 }
 0x22e   :  { %195 = vst.msk [vmem:[#allocation2] sm:$0xff] %vm20_vm1, %v193_v32  ;;  %v194_v35 = vadd.f32 %v189_v34, %v114_v31  ;;  %v256_v36 = vpop.f32.mrb[3].mxu1 }
 0x230   :  { %196 = vst.msk [vmem:[#allocation2 + $0x8] sm:$0xff] %vm20_vm1, %v194_v35 }
 0x235   :  { %v200_v37 = vld [vmem:[#allocation2] sm:$0xff] }
 0x236   :  { %202 = vst.msk [vmem:[#allocation3] sm:$0xff] %vm20_vm1, %v200_v37 }
 0x237   :  { %v201_v38 = vld [vmem:[#allocation2 + $0x8] sm:$0xff] }
 0x238   :  { %203 = vst.msk [vmem:[#allocation3 + $0x8] sm:$0xff] %vm20_vm1, %v201_v38 }
 0x239   :  { %289 = shalt.err (!%p286_p4)
}
 0x23a   :  { %s290_s29 = scalar_lea.hbm %s371_s3, 256 }
 0x23b   :  { %p291_p5 = scmp.ne.s32.totalorder %s371_s3, %s290_s29  ;;  %p294_p6 = scmp.lt.u32.totalorder %s290_s29, %s371_s3 }
 0x23d   :  { %p296_p7 = pnand %p294_p6, %p291_p5 }
 0x23f   :  { %299 = shalt.err (!%p296_p7)
}
 0x240   :  { %s306_s7 = smov 128   ;;  %s307_s8 = smov 8  }
 0x241   :  { %215 = dma.vmem_to_hbm [thread:$0]  %s210_s25, 256, %s371_s3, [#allocation4], %s306_s7, %s306_s7, %s307_s8  }
 0x242   :  { %300 = dma.done.wait [#allocation4], 256  }
 0x243   :  { %301 = vsyncadd [#allocation4], 4294967040 }
 0x244   :  { %219 = vsyncpa [#allocation4], 1 }

</bundles_post_ra>
